<compile_context>
chip_gen: v5e
topology: v5e:2x2
jax: 0.10.0
libtpu: 0.0.40
codegen_flags: <defaults>
</compile_context>

<pallas_src>
import functools
import math

import jax
import jax.numpy as jnp
from jax.experimental import pallas as pl
from jax.experimental.pallas import tpu as pltpu


def st_gcnn_kernel(x_ref, w12_ref, dsc_s_ref, dsc_b_ref, wout_ref, bias_ref,
                   prelu_ref, o_ref, *, mxu_dtype, identity_residual):
    """One grid step: Nb batch elements flattened to (Nb*C, T*V) rows."""
    xf = x_ref[...]                                            # (Nb*C, TV) mxu_dtype

    # ---- ConvTemporalGraphical: fused temporal+spatial mixing (one MXU dot)
    z = jnp.dot(xf, w12_ref[...], preferred_element_type=jnp.float32)

    # ---- depthwise 1x1 conv + folded eval-BatchNorm + ReLU6 (f32 VPU) -----
    # TODO(synk): Dropout(p=0.1) is implemented as eval-mode identity.
    h = jnp.clip(z * dsc_s_ref[...] + dsc_b_ref[...], 0.0, 6.0)

    if identity_residual:
        # pointwise conv only; residual is nn.Identity -> VPU add.
        acc = (jnp.dot(wout_ref[...], h.astype(mxu_dtype),
                       preferred_element_type=jnp.float32)
               + bias_ref[...] + xf.astype(jnp.float32))
    else:
        # pointwise conv + residual conv fused into one dot:
        # [PW | RES] @ [h ; xf]
        hx = jnp.concatenate([h.astype(mxu_dtype), xf], axis=0)   # (2*Nb*C, TV)
        acc = (jnp.dot(wout_ref[...], hx, preferred_element_type=jnp.float32)
               + bias_ref[...])                                   # (Nb*Cout, TV)

    # ---- PReLU once on the whole slab (f32), lane-dense store -------------
    a = prelu_ref[0, 0]
    o_ref[...] = jnp.where(acc >= 0.0, acc, a * acc)


def fold_bn(gamma, beta, mean, var, eps=1e-5):
    scale = gamma * jax.lax.rsqrt(var + eps)
    return scale, beta - mean * scale


def _pick_nb(N, C, Cout, TV, *, mxu_bytes, fused_out_k,
             vmem_budget=24 << 20, target_rows=256, min_grid_steps=1):
    """Largest divisor of N that fits the VMEM budget and >= min_grid_steps.

    Stops growing once Nb*C reaches target_rows (kron block-diag weights are
    O(Nb^2); beyond ~256 MXU rows larger Nb only wastes zero-flops/VMEM).
    """
    best = 1
    for nb in range(1, N + 1):
        if N % nb:
            continue
        if N // nb < min_grid_steps:
            break
        x_b = nb * C * TV * mxu_bytes
        out_b = nb * Cout * TV * 4
        w12_b = TV * TV * mxu_bytes
        wout_b = (nb * Cout) * (fused_out_k * nb * C) * mxu_bytes
        small = (2 * nb * C + nb * Cout) * 4
        est = 2 * (x_b + out_b + w12_b + wout_b + small)   # double-buffered
        if est > vmem_budget:
            continue
        best = nb
        if nb * C >= target_rows:
            break
    return best


def st_gcnn_forward(x, Amask, Tmask, params, *, stride=1,
                    mxu_dtype=jnp.bfloat16, min_grid_steps=1):
    N, C, T, V = x.shape
    Cout = params["pw_w"].shape[0]
    TV = T * V
    # Matches the PyTorch module: stride only gates the residual branch; the
    # main path (and the PyTorch residual conv) never downsamples T.
    use_res_conv = (stride != 1) or (C != Cout)
    identity_residual = not use_res_conv

    f32 = jnp.float32
    mxu_bytes = jnp.dtype(mxu_dtype).itemsize
    fused_k = 1 if identity_residual else 2
    Nb = _pick_nb(N, C, Cout, TV, mxu_bytes=mxu_bytes, fused_out_k=fused_k,
                  min_grid_steps=min_grid_steps)
    grid = (N // Nb,)

    # ---- grid-invariant parameter folding (no hot-path data compute) ------
    Tt = (Tmask * params["T"]).astype(f32)                    # (V, T, T)
    Aa = (Amask * params["A"]).astype(f32)                    # (T, V, V)
    # z[(q,w)] = sum_{t,v} x[(t,v)] * Tt[v,t,q] * Aa[q,v,w]
    W12 = jnp.einsum("vtq,qvw->tvqw", Tt, Aa).reshape(TV, TV).astype(mxu_dtype)

    bn1_s, bn1_b = fold_bn(params["bn1_gamma"], params["bn1_beta"],
                           params["bn1_mean"], params["bn1_var"])
    dsc_s = jnp.tile(params["dw_w"] * bn1_s, Nb).reshape(Nb * C, 1).astype(f32)
    dsc_b = jnp.tile(params["dw_b"] * bn1_s + bn1_b, Nb).reshape(Nb * C, 1).astype(f32)

    eye_nb = jnp.eye(Nb, dtype=f32)
    PW = jnp.kron(eye_nb, params["pw_w"].astype(f32))         # (Nb*Cout, Nb*C)
    if use_res_conv:
        bn2_s, bn2_b = fold_bn(params["bn2_gamma"], params["bn2_beta"],
                               params["bn2_mean"], params["bn2_var"])
        res_w_eff = params["res_w"].astype(f32) * bn2_s[:, None]   # (Cout, C)
        res_b_eff = params["res_b"] * bn2_s + bn2_b                # (Cout,)
        RES = jnp.kron(eye_nb, res_w_eff)                          # (Nb*Cout, Nb*C)
        Wout = jnp.concatenate([PW, RES], axis=1)                  # (Nb*Cout, 2*Nb*C)
        bias = jnp.tile(params["pw_b"] + res_b_eff, Nb).reshape(Nb * Cout, 1)
    else:
        Wout = PW                                                  # (Nb*Cout, Nb*C)
        bias = jnp.tile(params["pw_b"], Nb).reshape(Nb * Cout, 1)
    Wout = Wout.astype(mxu_dtype)
    bias = bias.astype(f32)
    prelu_a = params["prelu_a"].reshape(1, 1).astype(f32)

    # lane-dense 2-D slab; bf16 halves the streamed x DMA.
    x2 = x.reshape(N * C, TV).astype(mxu_dtype)

    kernel = functools.partial(st_gcnn_kernel, mxu_dtype=mxu_dtype,
                               identity_residual=identity_residual)

    # Advisory cost estimate for the XLA scheduler.
    flops = (2 * N * C * TV * TV
             + 2 * (N // Nb) * (Nb * Cout) * (fused_k * Nb * C) * TV)
    bytes_accessed = (x2.size * mxu_bytes + N * Cout * TV * 4
                      + W12.size * mxu_bytes + Wout.size * mxu_bytes
                      + (dsc_s.size + dsc_b.size + bias.size) * 4)

    smem = pl.BlockSpec(memory_space=pltpu.MemorySpace.SMEM)
    out2 = pl.pallas_call(
        kernel,
        out_shape=jax.ShapeDtypeStruct((N * Cout, TV), f32),
        grid=grid,
        in_specs=[
            pl.BlockSpec((Nb * C, TV), lambda n: (n, 0)),              # x slab
            pl.BlockSpec((TV, TV), lambda n: (0, 0)),                  # fused W12
            pl.BlockSpec((Nb * C, 1), lambda n: (0, 0)),               # dsc+BN scale
            pl.BlockSpec((Nb * C, 1), lambda n: (0, 0)),               # dsc+BN bias
            pl.BlockSpec((Nb * Cout, fused_k * Nb * C), lambda n: (0, 0)),  # [PW|RES]
            pl.BlockSpec((Nb * Cout, 1), lambda n: (0, 0)),            # fused bias
            smem,                                                      # PReLU slope
        ],
        out_specs=pl.BlockSpec((Nb * Cout, TV), lambda n: (n, 0)),
        compiler_params=pltpu.CompilerParams(
            dimension_semantics=("parallel",),
            vmem_limit_bytes=32 << 20),
        cost_estimate=pl.CostEstimate(flops=int(flops), transcendentals=0,
                                      bytes_accessed=int(bytes_accessed)),
    )(x2, W12, dsc_s, dsc_b, Wout, bias, prelu_a)
    return out2.reshape(N, Cout, T, V)


def ref_forward(x, Amask, Tmask, params):
    """Pure-JAX f32 reference (same eval-mode semantics as the PyTorch module)."""
    Tt = Tmask * params["T"]
    Aa = Amask * params["A"]
    g = jnp.einsum("nctv,vtq->ncqv", x, Tt)
    g = jnp.einsum("nctv,tvw->nctw", g, Aa)

    bn1_s, bn1_b = fold_bn(params["bn1_gamma"], params["bn1_beta"],
                           params["bn1_mean"], params["bn1_var"])
    h = g * params["dw_w"][None, :, None, None] + params["dw_b"][None, :, None, None]
    h = h * bn1_s[None, :, None, None] + bn1_b[None, :, None, None]
    h = jnp.clip(h, 0.0, 6.0)
    out = (jnp.einsum("oc,nctv->notv", params["pw_w"], h)
           + params["pw_b"][None, :, None, None])

    C, Cout = x.shape[1], params["pw_w"].shape[0]
    if C != Cout:
        bn2_s, bn2_b = fold_bn(params["bn2_gamma"], params["bn2_beta"],
                               params["bn2_mean"], params["bn2_var"])
        res = (jnp.einsum("oc,nctv->notv", params["res_w"], x)
               + params["res_b"][None, :, None, None])
        res = res * bn2_s[None, :, None, None] + bn2_b[None, :, None, None]
    else:
        res = x
    out = out + res
    a = params["prelu_a"]
    return jnp.where(out >= 0.0, out, a * out)


def init_params(key, Cin, Cout, Td, V):
    ks = jax.random.split(key, 16)
    u = lambda k, shape, lo, hi: jax.random.uniform(k, shape, jnp.float32, lo, hi)
    stdv_a = 1.0 / math.sqrt(V)
    stdv_t = 1.0 / math.sqrt(Td)
    stdv_c = 1.0 / math.sqrt(Cin)
    return {
        "A": u(ks[0], (Td, V, V), -stdv_a, stdv_a),
        "T": u(ks[1], (V, Td, Td), -stdv_t, stdv_t),
        "dw_w": u(ks[2], (Cin,), -1.0, 1.0),
        "dw_b": u(ks[3], (Cin,), -0.5, 0.5),
        "bn1_gamma": u(ks[4], (Cin,), 0.5, 1.5),
        "bn1_beta": u(ks[5], (Cin,), -0.2, 0.2),
        "bn1_mean": u(ks[6], (Cin,), -0.2, 0.2),
        "bn1_var": u(ks[7], (Cin,), 0.5, 1.5),
        "pw_w": u(ks[8], (Cout, Cin), -stdv_c, stdv_c),
        "pw_b": u(ks[9], (Cout,), -0.1, 0.1),
        "res_w": u(ks[10], (Cout, Cin), -stdv_c, stdv_c),
        "res_b": u(ks[11], (Cout,), -0.1, 0.1),
        "bn2_gamma": u(ks[12], (Cout,), 0.5, 1.5),
        "bn2_beta": u(ks[13], (Cout,), -0.2, 0.2),
        "bn2_mean": u(ks[14], (Cout,), -0.2, 0.2),
        "bn2_var": u(ks[15], (Cout,), 0.5, 1.5),
        "prelu_a": jnp.array([0.25], dtype=jnp.float32),
    }


if __name__ == "__main__":
    key = jax.random.PRNGKey(0)
    N, Cin, Cout, Td, V = 2, 4, 8, 8, 16      # batch, in_ch, out_ch, time, joints
    kx, ka, kt, kp = jax.random.split(key, 4)

    x = jax.random.normal(kx, (N, Cin, Td, V), jnp.float32)
    Amask = jax.random.bernoulli(ka, 0.7, (Td, V, V)).astype(jnp.float32)
    Tmask = jax.random.bernoulli(kt, 0.7, (V, Td, Td)).astype(jnp.float32)
    params = init_params(kp, Cin, Cout, Td, V)

    mxu_dtype = jnp.bfloat16        # bf16 MXU operands, f32 accumulate/epilogue
    out = st_gcnn_forward(x, Amask, Tmask, params, mxu_dtype=mxu_dtype)
    out = jax.block_until_ready(out)

    ref = ref_forward(x, Amask, Tmask, params)
    assert out.shape == (N, Cout, Td, V)
    err = float(jnp.max(jnp.abs(out - ref)))
    # 1e-3 for f32 MXU operands; bf16 operands (f32 accumulation) keep the
    # error within a few bf16 ulps of the O(1..6) activations.
    tol = 1e-3 if jnp.dtype(mxu_dtype) == jnp.dtype(jnp.float32) else 3e-2
    if err <= tol:
        print("KERNEL_OK")
    else:
        raise SystemExit(f"mismatch vs reference: max abs err = {err}")
</pallas_src>

<mosaic_0001>
module attributes {stable_mosaic.version = 11 : i64} {
  func.func @st_gcnn_kernel(%arg0: i32, %arg1: memref<8x128xbf16, #tpu.memory_space<vmem>>, %arg2: memref<128x128xbf16, #tpu.memory_space<vmem>>, %arg3: memref<8x1xf32, #tpu.memory_space<vmem>>, %arg4: memref<8x1xf32, #tpu.memory_space<vmem>>, %arg5: memref<16x16xbf16, #tpu.memory_space<vmem>>, %arg6: memref<16x1xf32, #tpu.memory_space<vmem>>, %arg7: memref<1x1xf32, #tpu.memory_space<smem>>, %arg8: memref<16x128xf32, #tpu.memory_space<vmem>>) attributes {dimension_semantics = [#tpu.dimension_semantics<parallel>], iteration_bounds = array<i64: 1>, scalar_prefetch = 0 : i64, scratch_operands = 0 : i64, tpu.core_type = #tpu.core_type<tc>, window_params = [{transform_indices = @transform_0, window_bounds = array<i64: 8, 128>}, {pipeline_mode = #tpu.pipeline_mode<synchronous>, transform_indices = @transform_1, window_bounds = array<i64: 128, 128>}, {pipeline_mode = #tpu.pipeline_mode<synchronous>, transform_indices = @transform_2, window_bounds = array<i64: 8, 1>}, {pipeline_mode = #tpu.pipeline_mode<synchronous>, transform_indices = @transform_3, window_bounds = array<i64: 8, 1>}, {pipeline_mode = #tpu.pipeline_mode<synchronous>, transform_indices = @transform_4, window_bounds = array<i64: 16, 16>}, {pipeline_mode = #tpu.pipeline_mode<synchronous>, transform_indices = @transform_5, window_bounds = array<i64: 16, 1>}, {transform_indices = @transform_6, window_bounds = array<i64: 1, 1>}, {transform_indices = @transform_7, window_bounds = array<i64: 16, 128>}]} {
    %c0 = arith.constant 0 : index
    %c0_0 = arith.constant 0 : index
    %0 = vector.load %arg1[%c0, %c0_0] : memref<8x128xbf16, #tpu.memory_space<vmem>>, vector<8x128xbf16>
    %c0_1 = arith.constant 0 : index
    %c0_2 = arith.constant 0 : index
    %1 = vector.load %arg2[%c0_1, %c0_2] : memref<128x128xbf16, #tpu.memory_space<vmem>>, vector<128x128xbf16>
    %cst = arith.constant dense<0.000000e+00> : vector<8x128xf32>
    %2 = tpu.matmul %0, %1, %cst {dimension_numbers = #tpu.dot_dimension_numbers<[1], [0], [0], [1], [0, 0, 1, 1], [], []>} : vector<8x128xbf16>, vector<128x128xbf16>, vector<8x128xf32> -> vector<8x128xf32>
    %c0_3 = arith.constant 0 : index
    %c0_4 = arith.constant 0 : index
    %3 = vector.load %arg3[%c0_3, %c0_4] : memref<8x1xf32, #tpu.memory_space<vmem>>, vector<8x1xf32>
    %4 = vector.broadcast %3 : vector<8x1xf32> to vector<8x128xf32>
    %5 = arith.mulf %2, %4 : vector<8x128xf32>
    %c0_5 = arith.constant 0 : index
    %c0_6 = arith.constant 0 : index
    %6 = vector.load %arg4[%c0_5, %c0_6] : memref<8x1xf32, #tpu.memory_space<vmem>>, vector<8x1xf32>
    %7 = vector.broadcast %6 : vector<8x1xf32> to vector<8x128xf32>
    %8 = arith.addf %5, %7 : vector<8x128xf32>
    %cst_7 = arith.constant 0.000000e+00 : f32
    %cst_8 = arith.constant 6.000000e+00 : f32
    %9 = vector.broadcast %cst_7 : f32 to vector<8x128xf32>
    %10 = arith.maximumf %9, %8 : vector<8x128xf32>
    %11 = vector.broadcast %cst_8 : f32 to vector<8x128xf32>
    %12 = arith.minimumf %11, %10 : vector<8x128xf32>
    %13 = arith.truncf %12 : vector<8x128xf32> to vector<8x128xbf16>
    %14 = tpu.concatenate %13, %0 in 0 : vector<8x128xbf16>, vector<8x128xbf16> -> vector<16x128xbf16>
    %c0_9 = arith.constant 0 : index
    %c0_10 = arith.constant 0 : index
    %15 = vector.load %arg5[%c0_9, %c0_10] : memref<16x16xbf16, #tpu.memory_space<vmem>>, vector<16x16xbf16>
    %cst_11 = arith.constant dense<0.000000e+00> : vector<16x128xf32>
    %16 = tpu.matmul %15, %14, %cst_11 {dimension_numbers = #tpu.dot_dimension_numbers<[1], [0], [0], [1], [0, 0, 1, 1], [], []>} : vector<16x16xbf16>, vector<16x128xbf16>, vector<16x128xf32> -> vector<16x128xf32>
    %c0_12 = arith.constant 0 : index
    %c0_13 = arith.constant 0 : index
    %17 = vector.load %arg6[%c0_12, %c0_13] : memref<16x1xf32, #tpu.memory_space<vmem>>, vector<16x1xf32>
    %18 = vector.broadcast %17 : vector<16x1xf32> to vector<16x128xf32>
    %19 = arith.addf %16, %18 : vector<16x128xf32>
    %c0_14 = arith.constant 0 : index
    %c0_15 = arith.constant 0 : index
    %20 = memref.load %arg7[%c0_14, %c0_15] : memref<1x1xf32, #tpu.memory_space<smem>>
    %cst_16 = arith.constant 0.000000e+00 : f32
    %21 = vector.broadcast %cst_16 : f32 to vector<16x128xf32>
    %22 = arith.cmpf oge, %19, %21 : vector<16x128xf32>
    %23 = vector.broadcast %20 : f32 to vector<16x128xf32>
    %24 = arith.mulf %23, %19 : vector<16x128xf32>
    %25 = arith.select %22, %19, %24 : vector<16x128xi1>, vector<16x128xf32>
    %c0_17 = arith.constant 0 : index
    %c0_18 = arith.constant 0 : index
    %26 = vector.load %arg8[%c0_17, %c0_18] : memref<16x128xf32, #tpu.memory_space<vmem>>, vector<16x128xf32>
    tpu.vector_store %arg8[%c0_17, %c0_18], %25 {strides = array<i32>} : memref<16x128xf32, #tpu.memory_space<vmem>>, vector<16x128xf32>,
    return
  }
  func.func @transform_0(%arg0: i32) -> (i32, i32) {
    %c0_i32 = arith.constant 0 : i32
    %c0_i32_0 = arith.constant 0 : i32
    return %arg0, %c0_i32 : i32, i32
  }
  func.func @transform_1(%arg0: i32) -> (i32, i32) {
    %c0_i32 = arith.constant 0 : i32
    %c0_i32_0 = arith.constant 0 : i32
    %c0_i32_1 = arith.constant 0 : i32
    return %c0_i32, %c0_i32_0 : i32, i32
  }
  func.func @transform_2(%arg0: i32) -> (i32, i32) {
    %c0_i32 = arith.constant 0 : i32
    %c0_i32_0 = arith.constant 0 : i32
    %c0_i32_1 = arith.constant 0 : i32
    return %c0_i32, %c0_i32_0 : i32, i32
  }
  func.func @transform_3(%arg0: i32) -> (i32, i32) {
    %c0_i32 = arith.constant 0 : i32
    %c0_i32_0 = arith.constant 0 : i32
    %c0_i32_1 = arith.constant 0 : i32
    return %c0_i32, %c0_i32_0 : i32, i32
  }
  func.func @transform_4(%arg0: i32) -> (i32, i32) {
    %c0_i32 = arith.constant 0 : i32
    %c0_i32_0 = arith.constant 0 : i32
    %c0_i32_1 = arith.constant 0 : i32
    return %c0_i32, %c0_i32_0 : i32, i32
  }
  func.func @transform_5(%arg0: i32) -> (i32, i32) {
    %c0_i32 = arith.constant 0 : i32
    %c0_i32_0 = arith.constant 0 : i32
    %c0_i32_1 = arith.constant 0 : i32
    return %c0_i32, %c0_i32_0 : i32, i32
  }
  func.func @transform_6(%arg0: i32) -> (i32, i32) {
    %c0_i32 = arith.constant 0 : i32
    %c0_i32_0 = arith.constant 0 : i32
    %c0_i32_1 = arith.constant 0 : i32
    return %c0_i32, %c0_i32_0 : i32, i32
  }
  func.func @transform_7(%arg0: i32) -> (i32, i32) {
    %c0_i32 = arith.constant 0 : i32
    %c0_i32_0 = arith.constant 0 : i32
    return %arg0, %c0_i32 : i32, i32
  }
}

</mosaic_0001>

<bundles_post_ra>
// kernel: tpu_custom_call.1
= control target key start
LH: loop header
LB: loop body
LE: loop exit
PB: predicated region body
PF: predicated region fallthrough
CT: control target
= control target key end

     0   :  { %13 = vsyncpa [#allocation4], 0  ;;  %s395_s0 = inlined_call_operand.vmem [shape: bf16[8,128], index: 0, kind: input, shape index: {}]   ;;  %s396_s1 = inlined_call_operand.hbm [shape: bf16[128,128], index: 1, kind: input, shape index: {}]   ;;  %s397_s2 = inlined_call_operand.vmem [shape: f32[8,1], index: 2, kind: input, shape index: {}]   ;;  %s398_s3 = inlined_call_operand.vmem [shape: f32[8,1], index: 3, kind: input, shape index: {}]   ;;  %s399_s4 = inlined_call_operand.vmem [shape: bf16[16,16], index: 4, kind: input, shape index: {}]   ;;  %s400_s5 = inlined_call_operand.vmem [shape: f32[16,1], index: 5, kind: input, shape index: {}]   ;;  %s401_s6 = inlined_call_operand.<no memory space> [shape: f32[1,1], index: 6, kind: input, shape index: {}]   ;;  %s402_s7 = inlined_call_operand.hbm [shape: f32[16,128], index: 7, kind: output, shape index: {}]  }
   0x1   :  { %14 = vsyncpa [#allocation5], 0  ;;  %s21_s26 = sshll.u32 %s396_s1, 4  ;;  %s321_s27 = smov [#allocation3]   ;;  %s22_s26 = int_to_ptr.hbm [resolvable:$true] %s21_s26 }
   0x2   :  { %s23_s28 = sshll.u32 %s321_s27, 4  ;;  %s322_s29 = smov 64   ;;  %s24_s28 = int_to_ptr.vmem [resolvable:$true] %s23_s28 }
   0x3   :  { %s323_s30 = smov 4  }
   0x4   :  { %29 = dma.hbm_to_vmem [thread:$0]  %s22_s26, 1024, %s24_s28, [#allocation4], %s322_s29, %s322_s29, %s323_s30  }
   0x5   :  { %317 = dma.done.wait [#allocation4], 1024  }
   0x6   :  { %318 = vsyncadd [#allocation4], 4294966272  ;;  %v324_v0 = vmov 0   ;;  %v258_v1 = vld [vmem:[#allocation3 + $0x38] sm:$0xff]  ;;  %v257_v2 = vld [vmem:[#allocation3 + $0x30] sm:$0xff]  ;;  %vm143_vm0 = vcmask 1043456   ;;  %v188_v29 = vstv %s401_s6 }
   0x7   :  { %267 = vset.pattern.permute.xlu0 %v324_v0  ;;  %268 = vset.pattern.permute.xlu1 %v324_v0  ;;  %v123_v3 = vld [vmem:[%s397_s2] sm:$0xff]  ;;  %v256_v4 = vld [vmem:[#allocation3 + $0x28] sm:$0xff]  ;;  %v254_v7 = vld [vmem:[#allocation3 + $0x18] sm:$0xff]  ;;  %vm167_vm1 = vcmask 130048   ;;  %s325_s17 = smov [#allocation6]   ;;  %s201_s20 = sshll.u32 %s402_s7, 4  ;;  %s202_s20 = int_to_ptr.hbm [resolvable:$true] %s201_s20 }
   0x8   :  { %110 = vmatpush.bf16.msra.mxu0 %v258_v1  ;;  %126 = vperm.xlu0 %267, %v123_v3   ;;  %v130_v5 = vld [vmem:[%s398_s3] sm:$0xff]  ;;  %v253_v8 = vld [vmem:[#allocation3 + $0x10] sm:$0xff]  ;;  %v252_v9 = vld [vmem:[#allocation3 + $0x8] sm:$0xff]  ;;  %s199_s18 = sshll.u32 %s325_s17, 4  ;;  %s326_s6 = smov 128   ;;  %s200_s18 = int_to_ptr.vmem [resolvable:$true] %s199_s18 }
   0x9   :  { %v255_v6 = vld [vmem:[#allocation3 + $0x20] sm:$0xff]  ;;  %v151_v13 = vld [vmem:[%s400_s5 + $0x8] sm:$0xff]  ;;  %s327_s21 = smov 8  }
   0xa   :  { %v251_v10 = vld [vmem:[#allocation3] sm:$0xff] }
   0xb   :  { %v45_v11 = vld [vmem:[%s395_s0] sm:$0xf] }
   0xc   :  { %111 = vmatpush.bf16.msra.mxu0 %v257_v2  ;;  %v150_v12 = vld [vmem:[%s400_s5] sm:$0xff]  ;;  %v141_v18 = vunpack.c.l.b16 %v45_v11 }
   0xd   :  { %154 = vperm.xlu1 %268, %v150_v12   ;;  %v259_v26 = vld [vmem:[%s399_s4] sm:$0xff] }
   0xe   :  { %v142_v21 = vpack.c.b16 %v141_v18, %v141_v18 }
  0x10   :  { %112 = vmatpush.bf16.msra.mxu0 %v256_v4  ;;  %133 = vperm.xlu0 %267, %v130_v5  }
  0x14   :  { %113 = vmatpush.bf16.msra.mxu0 %v255_v6 }
  0x15   :  { %159 = vperm.xlu1 %268, %v151_v13  }
  0x18   :  { %114 = vmatpush.bf16.msra.mxu0 %v254_v7 }
  0x1c   :  { %115 = vmatpush.bf16.msra.mxu0 %v253_v8 }
  0x20   :  { %116 = vmatpush.bf16.msra.mxu0 %v252_v9 }
  0x24   :  { %117 = vmatpush.bf16.msra.mxu0 %v251_v10 }
  0x27   :  { %118 = vmatmul.bf16.vlgmr.msra.gmra.mxu0 %v45_v11 }
  0x7a   :  { %v127_v14 = vpop.permute.xlu0 %126 }
  0x7f   :  { %v155_v27 = vpop.permute.xlu1 %154 }
  0x82   :  { %v134_v17 = vpop.permute.xlu0 %133 }
  0x87   :  { %v160_v33 = vpop.permute.xlu1 %159 }
  0xa4   :  { %v119_v15 = vpop.f32.mrf.mxu0 }
  0xa5   :  { %v129_v16 = vmul.f32 %v127_v14, %v119_v15 }
  0xa7   :  { %v136_v19 = vadd.f32 %v134_v17, %v129_v16 }
  0xa9   :  { %v137_v20 = vmax.f32 %v136_v19, 0.0 }
  0xab   :  { %v138_v22 = vmin.f32 %v137_v20, 6.0 }
  0xac   :  { %v121_v23 = vpop.f32.mrf.mxu0 }
  0xad   :  { %v139_v24 = vpack.c.bf16 %v138_v22, %v138_v22 }
  0xaf   :  { %v146_v25 = vsel %vm143_vm0, %v139_v24, %v142_v21 }
  0xb0   :  { %178 = vmatpush.bf16.msra.mxu1 %v146_v25 }
  0xb3   :  { %250 = vmatmul.msk.bf16.vlgmr.msra.gmra.mxu1 %vm167_vm1, %v259_v26 }
 0x130   :  { %v180_v28 = vpop.f32.mrf.mxu1 }
 0x131   :  { %v181_v30 = vadd.f32 %v180_v28, %v155_v27 }
 0x133   :  { %vm186_vm2 = vcmp.ge.f32.partialorder %v181_v30, 0.0  ;;  %v189_v31 = vmul.f32 %v188_v29, %v181_v30 }
 0x135   :  { %v191_v32 = vsel %vm186_vm2, %v181_v30, %v189_v31 }
 0x136   :  { %193 = vst [vmem:[#allocation6] sm:$0xff] %v191_v32 }
 0x138   :  { %v182_v34 = vpop.f32.mrf.mxu1 }
 0x139   :  { %v183_v35 = vadd.f32 %v182_v34, %v160_v33 }
 0x13b   :  { %vm187_vm3 = vcmp.ge.f32.partialorder %v183_v35, 0.0  ;;  %v190_v36 = vmul.f32 %v188_v29, %v183_v35 }
 0x13d   :  { %v192_v37 = vsel %vm187_vm3, %v183_v35, %v190_v36 }
 0x13e   :  { %194 = vst [vmem:[#allocation6 + $0x8] sm:$0xff] %v192_v37 }
 0x13f   :  { %207 = dma.vmem_to_hbm [thread:$0]  %s200_s18, 256, %s202_s20, [#allocation5], %s326_s6, %s326_s6, %s327_s21  }
 0x140   :  { %319 = dma.done.wait [#allocation5], 256  }
 0x141   :  { %320 = vsyncadd [#allocation5], 4294967040 }
 0x142   :  { %212 = vsyncpa [#allocation4], 1 }
 0x143   :  { %213 = vsyncpa [#allocation5], 1 }

</bundles_post_ra>
